<compile_context>
chip_gen: v7x
topology: tpu7x:2x2x1
jax: 0.10.0
libtpu: 0.0.40
codegen_flags: <defaults>
</compile_context>

<pallas_src>
import functools
import math

import jax
import jax.numpy as jnp
from jax.experimental import pallas as pl
from jax.experimental.pallas import tpu as pltpu


# ---------------------------------------------------------------------------
# Fast path: whole x slab resident in VMEM, rows gathered with vector loads.
# ---------------------------------------------------------------------------
def _gather_vmem_kernel(idx0_ref, idx1_ref, x_ref, o_ref, *, dim0, dim1):
    """x_ref: VMEM (N*C, 1, R); o_ref: VMEM (n, 1, R); idx refs: SMEM (n,)."""
    n = o_ref.shape[0]
    for i in range(n):
        i0 = idx0_ref[i]
        i1 = idx1_ref[i]
        # PyTorch-style negative-index wrap, done on the scalar unit for free.
        i0 = jnp.where(i0 < 0, i0 + dim0, i0)
        i1 = jnp.where(i1 < 0, i1 + dim1, i1)
        row = i0 * dim1 + i1
        o_ref[i] = x_ref[row]          # dynamic select on the leading dim


# ---------------------------------------------------------------------------
# Large path: per-row HBM->HBM DMA gather (no VMEM staging, no write-back).
# ---------------------------------------------------------------------------
def _gather_dma_kernel(idx0_ref, idx1_ref, x_hbm_ref, o_hbm_ref, copy_sems,
                       *, dim0, dim1):
    """x_hbm_ref: HBM (N*C, 1, R); o_hbm_ref: HBM (n, 1, R); idx refs: SMEM."""
    n = idx0_ref.shape[0]
    # Build every descriptor (all SMEM index reads + address math) BEFORE any
    # wait, so .wait() cannot stall the scalar slot via broken sst->sld
    # forwarding; then start all copies so their latencies overlap.
    copies = []
    for i in range(n):
        i0 = idx0_ref[i]
        i1 = idx1_ref[i]
        i0 = jnp.where(i0 < 0, i0 + dim0, i0)
        i1 = jnp.where(i1 < 0, i1 + dim1, i1)
        row = i0 * dim1 + i1
        copies.append(
            pltpu.make_async_copy(
                x_hbm_ref.at[row],      # source row in HBM
                o_hbm_ref.at[i],        # destination row in HBM (no VMEM hop)
                copy_sems.at[i],
            )
        )
    for cp in copies:
        cp.start()
    for cp in copies:
        cp.wait()
    # TODO(synk): for very large n, coalesce contiguous index runs into
    # multi-row DMAs, rotate a small semaphore pool, and chunk n over a
    # "parallel" grid axis (unlocks the second TensorCore on v7x).


# Keep worst-case VMEM (2 x-bufs + 2 out-bufs) well under v7x's scoped limit.
_FAST_PATH_X_BYTES = 8 * 1024 * 1024
_FAST_PATH_OUT_BYTES = 4 * 1024 * 1024
# TODO(synk): on v5e/v6e (128 MiB VMEM) these thresholds could be much larger.


def index_tensor(x, idx0, idx1):
    """out[i] = x[idx0[i], idx1[i]] ; out shape = (len(idx0),) + x.shape[2:]."""
    N, C = int(x.shape[0]), int(x.shape[1])
    trailing = tuple(int(d) for d in x.shape[2:])
    row_elems = math.prod(trailing) if trailing else 1
    n = int(idx0.shape[0])
    itemsize = jnp.dtype(x.dtype).itemsize

    # Lane-dense layout plumbing (free reshape): each gathered row is one
    # contiguous slab; for the test shape its last dim (256) is a multiple of
    # 128 lanes -> unmasked stores / single contiguous DMA descriptors.
    # Leading row axis keeps all dynamic indexing on a non-tiled dimension.
    x_rows = x.reshape(N * C, 1, row_elems)
    idx0 = idx0.astype(jnp.int32)
    idx1 = idx1.astype(jnp.int32)
    # TODO(synk): flat index is computed in int32; gigantic N*C could overflow.

    x_bytes = N * C * row_elems * itemsize
    out_bytes = n * row_elems * itemsize
    use_fast_path = (x_bytes <= _FAST_PATH_X_BYTES
                     and out_bytes <= _FAST_PATH_OUT_BYTES)

    if use_fast_path:
        kernel = functools.partial(_gather_vmem_kernel, dim0=N, dim1=C)
        grid_spec = pltpu.PrefetchScalarGridSpec(
            num_scalar_prefetch=2,               # idx0, idx1 land in SMEM
            grid=(1,),                           # single step: all gathers batched
            in_specs=[pl.BlockSpec((N * C, 1, row_elems),
                                   lambda i, i0, i1: (0, 0, 0))],
            out_specs=pl.BlockSpec((n, 1, row_elems),
                                   lambda i, i0, i1: (0, 0, 0)),
            scratch_shapes=[],
        )
        compiler_params = pltpu.CompilerParams(
            dimension_semantics=("arbitrary",),
            vmem_limit_bytes=32 * 1024 * 1024,   # safe on v5e/v6e/v7x
        )
        cost = pl.CostEstimate(flops=0, transcendentals=0,
                               bytes_accessed=x_bytes + out_bytes + 2 * n * 4)
    else:
        kernel = functools.partial(_gather_dma_kernel, dim0=N, dim1=C)
        grid_spec = pltpu.PrefetchScalarGridSpec(
            num_scalar_prefetch=2,
            grid=(1,),
            in_specs=[pl.BlockSpec(memory_space=pl.ANY)],   # raw HBM, manual DMA
            out_specs=pl.BlockSpec(memory_space=pl.ANY),    # raw HBM, manual DMA
            scratch_shapes=[pltpu.SemaphoreType.DMA((n,))],
        )
        compiler_params = pltpu.CompilerParams(
            dimension_semantics=("arbitrary",),
            vmem_limit_bytes=32 * 1024 * 1024,
            has_side_effects=True,
        )
        cost = pl.CostEstimate(flops=0, transcendentals=0,
                               bytes_accessed=2 * out_bytes + 2 * n * 4)

    out_rows = pl.pallas_call(
        kernel,
        out_shape=jax.ShapeDtypeStruct((n, 1, row_elems), x.dtype),
        grid_spec=grid_spec,
        compiler_params=compiler_params,
        cost_estimate=cost,
    )(idx0, idx1, x_rows)

    return out_rows.reshape((n,) + trailing)


def index_tensor_model_forward(x):
    """Pallas equivalent of IndexTensorModel.forward: x[[[0, 1], [0, 1]]]."""
    # TODO(synk): implements the PyTorch "treat top-level list as tuple" rule,
    # i.e. x[[0,1],[0,1]] -> (2, H, W); a nested 2-D index on dim 0 alone would
    # instead give (2, 2, C, H, W).
    idx0 = jnp.array([0, 1], dtype=jnp.int32)
    idx1 = jnp.array([0, 1], dtype=jnp.int32)
    return index_tensor(x, idx0, idx1)


if __name__ == "__main__":
    key = jax.random.PRNGKey(0)
    # Small shapes consistent with the forward: N >= 2 and C >= 2 so that
    # indices [0, 1] along dims 0 and 1 are valid.
    N, C, H, W = 2, 4, 16, 16
    x = jax.random.normal(key, (N, C, H, W), dtype=jnp.float32)

    out = index_tensor_model_forward(x)
    out = jax.block_until_ready(out)

    # Reference: plain-JAX advanced indexing (matches torch x[[0,1],[0,1]]).
    idx0 = jnp.array([0, 1], dtype=jnp.int32)
    idx1 = jnp.array([0, 1], dtype=jnp.int32)
    ref = x[idx0, idx1]
    assert out.shape == ref.shape == (2, H, W), (out.shape, ref.shape)
    assert jnp.allclose(out, ref)

    print("KERNEL_OK")
</pallas_src>

<mosaic_0001>
module attributes {stable_mosaic.version = 11 : i64} {
  func.func @_gather_vmem_kernel(%arg0: i32, %arg1: memref<2xi32, #tpu.memory_space<smem>>, %arg2: memref<2xi32, #tpu.memory_space<smem>>, %arg3: memref<8x1x256xf32, #tpu.memory_space<vmem>>, %arg4: memref<2x1x256xf32, #tpu.memory_space<vmem>>) attributes {dimension_semantics = [#tpu.dimension_semantics<arbitrary>], iteration_bounds = array<i64: 1>, scalar_prefetch = 2 : i64, scratch_operands = 0 : i64, tpu.core_type = #tpu.core_type<tc>, window_params = [{pipeline_mode = #tpu.pipeline_mode<synchronous>, transform_indices = @transform_0, window_bounds = array<i64: 8, 1, 256>}, {pipeline_mode = #tpu.pipeline_mode<synchronous>, transform_indices = @transform_1, window_bounds = array<i64: 2, 1, 256>}]} {
    %c0 = arith.constant 0 : index
    %0 = memref.load %arg1[%c0] : memref<2xi32, #tpu.memory_space<smem>>
    %c0_0 = arith.constant 0 : index
    %1 = memref.load %arg2[%c0_0] : memref<2xi32, #tpu.memory_space<smem>>
    %c0_i32 = arith.constant 0 : i32
    %2 = arith.cmpi slt, %0, %c0_i32 : i32
    %c2_i32 = arith.constant 2 : i32
    %3 = arith.addi %0, %c2_i32 : i32
    %4 = arith.select %2, %3, %0 : i32
    %c0_i32_1 = arith.constant 0 : i32
    %5 = arith.cmpi slt, %1, %c0_i32_1 : i32
    %c4_i32 = arith.constant 4 : i32
    %6 = arith.addi %1, %c4_i32 : i32
    %7 = arith.select %5, %6, %1 : i32
    %c4_i32_2 = arith.constant 4 : i32
    %8 = arith.muli %4, %c4_i32_2 : i32
    %9 = arith.addi %8, %7 : i32
    %10 = arith.index_cast %9 : i32 to index
    %c0_3 = arith.constant 0 : index
    %c0_4 = arith.constant 0 : index
    %11 = vector.load %arg3[%10, %c0_3, %c0_4] : memref<8x1x256xf32, #tpu.memory_space<vmem>>, vector<1x1x256xf32>
    %12 = vector.shape_cast %11 : vector<1x1x256xf32> to vector<1x256xf32>
    %c0_5 = arith.constant 0 : index
    %c0_6 = arith.constant 0 : index
    %c0_7 = arith.constant 0 : index
    %13 = vector.load %arg4[%c0_5, %c0_6, %c0_7] : memref<2x1x256xf32, #tpu.memory_space<vmem>>, vector<1x1x256xf32>
    %14 = vector.shape_cast %13 : vector<1x1x256xf32> to vector<1x256xf32>
    %15 = vector.shape_cast %12 : vector<1x256xf32> to vector<1x1x256xf32>
    tpu.vector_store %arg4[%c0_5, %c0_6, %c0_7], %15 {strides = array<i32>} : memref<2x1x256xf32, #tpu.memory_space<vmem>>, vector<1x1x256xf32>,
    %c1 = arith.constant 1 : index
    %16 = memref.load %arg1[%c1] : memref<2xi32, #tpu.memory_space<smem>>
    %c1_8 = arith.constant 1 : index
    %17 = memref.load %arg2[%c1_8] : memref<2xi32, #tpu.memory_space<smem>>
    %c0_i32_9 = arith.constant 0 : i32
    %18 = arith.cmpi slt, %16, %c0_i32_9 : i32
    %c2_i32_10 = arith.constant 2 : i32
    %19 = arith.addi %16, %c2_i32_10 : i32
    %20 = arith.select %18, %19, %16 : i32
    %c0_i32_11 = arith.constant 0 : i32
    %21 = arith.cmpi slt, %17, %c0_i32_11 : i32
    %c4_i32_12 = arith.constant 4 : i32
    %22 = arith.addi %17, %c4_i32_12 : i32
    %23 = arith.select %21, %22, %17 : i32
    %c4_i32_13 = arith.constant 4 : i32
    %24 = arith.muli %20, %c4_i32_13 : i32
    %25 = arith.addi %24, %23 : i32
    %26 = arith.index_cast %25 : i32 to index
    %c0_14 = arith.constant 0 : index
    %c0_15 = arith.constant 0 : index
    %27 = vector.load %arg3[%26, %c0_14, %c0_15] : memref<8x1x256xf32, #tpu.memory_space<vmem>>, vector<1x1x256xf32>
    %28 = vector.shape_cast %27 : vector<1x1x256xf32> to vector<1x256xf32>
    %c1_16 = arith.constant 1 : index
    %c0_17 = arith.constant 0 : index
    %c0_18 = arith.constant 0 : index
    %29 = vector.load %arg4[%c1_16, %c0_17, %c0_18] : memref<2x1x256xf32, #tpu.memory_space<vmem>>, vector<1x1x256xf32>
    %30 = vector.shape_cast %29 : vector<1x1x256xf32> to vector<1x256xf32>
    %31 = vector.shape_cast %28 : vector<1x256xf32> to vector<1x1x256xf32>
    tpu.vector_store %arg4[%c1_16, %c0_17, %c0_18], %31 {strides = array<i32>} : memref<2x1x256xf32, #tpu.memory_space<vmem>>, vector<1x1x256xf32>,
    return
  }
  func.func @transform_0(%arg0: i32, %arg1: memref<2xi32, #tpu.memory_space<smem>>, %arg2: memref<2xi32, #tpu.memory_space<smem>>) -> (i32, i32, i32) {
    %c0_i32 = arith.constant 0 : i32
    %c0_i32_0 = arith.constant 0 : i32
    %c0_i32_1 = arith.constant 0 : i32
    %c0_i32_2 = arith.constant 0 : i32
    return %c0_i32, %c0_i32_0, %c0_i32_1 : i32, i32, i32
  }
  func.func @transform_1(%arg0: i32, %arg1: memref<2xi32, #tpu.memory_space<smem>>, %arg2: memref<2xi32, #tpu.memory_space<smem>>) -> (i32, i32, i32) {
    %c0_i32 = arith.constant 0 : i32
    %c0_i32_0 = arith.constant 0 : i32
    %c0_i32_1 = arith.constant 0 : i32
    %c0_i32_2 = arith.constant 0 : i32
    return %c0_i32, %c0_i32_0, %c0_i32_1 : i32, i32, i32
  }
}

</mosaic_0001>

<bundles_post_ra>
// kernel: tpu_custom_call.1
= control target key start
LH: loop header
LB: loop body
LE: loop exit
PB: predicated region body
PF: predicated region fallthrough
CT: control target
= control target key end

     0   :  { %s254_s0 = inlined_call_operand.hbm [shape: s32[2], index: 0, kind: input, shape index: {}]   ;;  %s255_s2 = inlined_call_operand.hbm [shape: f32[8,1,256], index: 2, kind: input, shape index: {}]   ;;  %s256_s3 = inlined_call_operand.hbm [shape: f32[2,1,256], index: 3, kind: output, shape index: {}]   ;;  %s257_s1 = inlined_call_operand.vmem [shape: s32[2], index: 1, kind: input, shape index: {}]  }
   0x1   :  { %s103_s14 = scalar_lea.hbm %s254_s0, 16 }
   0x2   :  { %p104_p0 = scmp.ne.s32.totalorder %s254_s0, %s103_s14  ;;  %p107_p1 = scmp.lt.u32.totalorder %s103_s14, %s254_s0 }
   0x4   :  { %p109_p2 = pnand %p107_p1, %p104_p0 }
   0x6   :  { %112 = shalt.err (!%p109_p2)  }
   0x7   :  { %s175_s19 = smov [#allocation3]   ;;  %s10_s24 = sshll.u32 %s257_s1, 4  ;;  %s11_s24 = int_to_ptr.vmem [resolvable:$true] %s10_s24 }
   0x8   :  { %9 = dma.hbm_to_smem %s254_s0, 16, %s175_s19, [#allocation2] }
   0x9   :  { %s113_s25 = scalar_lea.vmem %s11_s24, 16  ;;  %p118_p4 = scmp.lt.s32.totalorder %s11_s24, %s11_s24 }
   0xa   :  { %p114_p3 = scmp.ne.s32.totalorder %s11_s24, %s113_s25  ;;  %p119_p5 = scmp.lt.s32.totalorder %s113_s25, %s113_s25 }
   0xc   :  { %p120_p6 = por %p119_p5, %p118_p4 }
   0xe   :  { %p121_p7 = pnand %p120_p6, %p114_p3 }
  0x10   :  { %124 = shalt.err (!%p121_p7)  }
  0x11   :  { %s176_s26 = smov [#allocation4]  }
  0x12   :  { %13 = dma.vmem_to_smem %s11_s24, 16, %s176_s26, [#allocation2] }
  0x13   :  { %169 = dma.done.wait [#allocation2], 32 }
  0x14   :  { %170 = vsyncadd [#allocation2], 4294967264 }
  0x15   :  { %15 = sfence }
  0x16   :  { %16 = vsyncpa [#allocation6], 0 }
  0x17   :  { %17 = vsyncpa [#allocation7], 0  ;;  %s177_s0 = smov [#allocation5]   ;;  %s125_s29 = scalar_lea.hbm %s255_s2, 256 }
  0x18   :  { %s23_s27 = sshll.u32 %s177_s0, 4  ;;  %p126_p8 = scmp.ne.s32.totalorder %s255_s2, %s125_s29  ;;  %s24_s27 = int_to_ptr.vmem [resolvable:$true] %s23_s27 }
  0x19   :  { %p129_p9 = scmp.lt.u32.totalorder %s125_s29, %s255_s2 }
  0x1b   :  { %p131_p10 = pnand %p129_p9, %p126_p8 }
  0x1d   :  { %134 = shalt.err (!%p131_p10)
}
  0x1e   :  { %s135_s7 = scalar_lea.vmem %s24_s27, 256  ;;  %p140_p12 = scmp.lt.s32.totalorder %s24_s27, %s24_s27 }
  0x1f   :  { %p136_p11 = scmp.ne.s32.totalorder %s24_s27, %s135_s7  ;;  %p141_p13 = scmp.lt.s32.totalorder %s135_s7, %s135_s7 }
  0x21   :  { %p142_p0 = por %p141_p13, %p140_p12 }
  0x23   :  { %p143_p1 = pnand %p142_p0, %p136_p11 }
  0x25   :  { %146 = shalt.err (!%p143_p1)
}
  0x26   :  { %s178_s8 = smov 32   ;;  %s179_s9 = smov 2  }
  0x27   :  { %29 = dma.hbm_to_vmem [thread:$0]  %s255_s2, 256, %s24_s27, [#allocation6], %s178_s8, %s178_s8, %s179_s9  }
  0x28   :  { %171 = dma.done.wait [#allocation6], 256  }
  0x29   :  { %172 = vsyncadd [#allocation6], 4294967040  ;;  %s33_s12 = sld [smem:[#allocation3]]  ;;  %s93_s14 = sld [smem:[#allocation3 + $0x1]]  ;;  %v46_v0 = vlaneseq }
  0x2a   :  { %s34_s13 = sld [smem:[#allocation4]]  ;;  %s94_s15 = sld [smem:[#allocation4 + $0x1]] }
  0x2b   :  { %vm231_vm0 = vcmp.lt.s32.totalorder %v46_v0, 256  ;;  %s180_s24 = smov [#allocation8]  }
  0x2c   :  { %s71_s25 = sshll.u32 %s180_s24, 4  ;;  %s72_s25 = int_to_ptr.vmem [resolvable:$true] %s71_s25 }
  0x2d   :  { %s147_s28 = scalar_lea.vmem %s72_s25, 64  ;;  %p152_p7 = scmp.lt.s32.totalorder %s72_s25, %s72_s25 }
  0x2e   :  { %p148_p6 = scmp.ne.s32.totalorder %s72_s25, %s147_s28  ;;  %p153_p8 = scmp.lt.s32.totalorder %s147_s28, %s147_s28 }
  0x2f   :  { %p35_p2 = scmp.lt.s32.totalorder %s33_s12, 0  ;;  %s36_s16 = sadd.s32 2, %s33_s12 }
  0x30   :  { %p38_p3 = scmp.lt.s32.totalorder %s34_s13, 0  ;;  %s39_s17 = sadd.s32 4, %s34_s13 }
  0x31   :  { %s261_s16 = smov (!%p35_p2, %s36_s16), %s33_s12  ;;  %p53_p4 = scmp.lt.s32.totalorder %s93_s14, 0 }
  0x32   :  { %s263_s17 = smov (!%p38_p3, %s39_s17), %s34_s13  ;;  %s91_s18 = sshll.u32 %s261_s16, 2 }
  0x33   :  { %s42_s19 = sadd.s32 %s91_s18, %s263_s17  ;;  %s54_s20 = sadd.s32 2, %s93_s14 }
  0x34   :  { %s92_s21 = sshll.u32 %s42_s19, 1  ;;  %p56_p5 = scmp.lt.s32.totalorder %s94_s15, 0 }
  0x35   :  { %s57_s2 = sadd.s32 4, %s94_s15  ;;  %s44_s22 = scalar_lea.vmem [#allocation5], %s92_s21 }
  0x36   :  { %v45_v2 = vld [vmem:[%s44_s22] sm:$0x3]  ;;  %s265_s20 = smov (!%p53_p4, %s54_s20), %s93_s14  ;;  %s267_s2 = smov (!%p56_p5, %s57_s2), %s94_s15 }
  0x37   :  { %50 = vst.msk [vmem:[#allocation8] sm:$0x3] %vm231_vm0, %v45_v2  ;;  %s95_s23 = sshll.u32 %s265_s20, 2  ;;  %p154_p9 = por %p153_p8, %p152_p7 }
  0x38   :  { %s60_s26 = sadd.s32 %s95_s23, %s267_s2 }
  0x39   :  { %s96_s0 = sshll.u32 %s60_s26, 1  ;;  %p155_p10 = pnand %p154_p9, %p148_p6 }
  0x3a   :  { %s62_s27 = scalar_lea.vmem [#allocation5], %s96_s0 }
  0x3b   :  { %v63_v3 = vld [vmem:[%s62_s27] sm:$0x3] }
  0x3c   :  { %65 = vst.msk [vmem:[#allocation8 + $0x2] sm:$0x3] %vm231_vm0, %v63_v3 }
  0x3d   :  { %158 = shalt.err (!%p155_p10)
}
  0x3e   :  { %s159_s30 = scalar_lea.hbm %s256_s3, 64 }
  0x3f   :  { %p160_p11 = scmp.ne.s32.totalorder %s256_s3, %s159_s30  ;;  %p163_p12 = scmp.lt.u32.totalorder %s159_s30, %s256_s3 }
  0x41   :  { %p165_p13 = pnand %p163_p12, %p160_p11 }
  0x43   :  { %168 = shalt.err (!%p165_p13)
}
  0x44   :  { %77 = dma.vmem_to_hbm [thread:$0]  %s72_s25, 64, %s256_s3, [#allocation7], %s178_s8, %s178_s8, %s179_s9  }
  0x45   :  { %173 = dma.done.wait [#allocation7], 64  }
  0x46   :  { %174 = vsyncadd [#allocation7], 4294967232 }
  0x47   :  { %81 = vsyncpa [#allocation6], 1 }
  0x48   :  { %82 = vsyncpa [#allocation7], 1 }

</bundles_post_ra>
